<compile_context>
chip_gen: v6e
topology: v6e:2x2x1
jax: 0.10.0
libtpu: 0.0.40
codegen_flags: <defaults>
</compile_context>

<pallas_src>
import jax
import jax.numpy as jnp
from jax.experimental import pallas as pl
from jax.experimental.pallas import tpu as pltpu

NEG_SLOPE = 0.01                      # PyTorch nn.LeakyReLU default
SIZES = [12, 80, 80, 40, 20, 1]       # layer sizes of the reference MLP
PERM = (3, 4, 5, 0, 1, 2, 6, 7, 8, 9, 10, 11)   # involutive column permutation


def _leaky_relu(h):
    return jnp.where(h > 0, h, NEG_SLOPE * h)


def _round_up(n, m):
    return ((n + m - 1) // m) * m


def _block_diag2(w):
    """[[w, 0], [0, w]] for a 2-D weight."""
    k, n = w.shape
    z = jnp.zeros((k, n), w.dtype)
    top = jnp.concatenate([w, z], axis=1)
    bot = jnp.concatenate([z, w], axis=1)
    return jnp.concatenate([top, bot], axis=0)


def _kernel(x_ref,
            w1_ref, b1_ref,
            w2_ref, b2_ref,
            w3_ref, b3_ref,
            w4_ref, b4_ref,
            w5d_ref,
            o_ref):
    """One batch tile: both CP paths, lane-packed through all layers."""
    x = x_ref[...]                                           # (TB, 12)  f32

    # Layer 1 (f32, K=12): both paths in one dot -> (TB, 160).
    h = jnp.dot(x, w1_ref[...], preferred_element_type=jnp.float32) + b1_ref[...]
    h = _leaky_relu(h)

    # Layers 2-4: bf16 operands, f32 accumulation, block-diagonal weights.
    h = jnp.dot(h.astype(jnp.bfloat16), w2_ref[...],
                preferred_element_type=jnp.float32) + b2_ref[...]   # (TB, 160)
    h = _leaky_relu(h)
    h = jnp.dot(h.astype(jnp.bfloat16), w3_ref[...],
                preferred_element_type=jnp.float32) + b3_ref[...]   # (TB, 80)
    h = _leaky_relu(h)
    h = jnp.dot(h.astype(jnp.bfloat16), w4_ref[...],
                preferred_element_type=jnp.float32) + b4_ref[...]   # (TB, 40)
    h = _leaky_relu(h)

    # Final layer + path difference fused as a VPU multiply + XLU lane reduce:
    #   y = h[:, :20] @ w5  -  h[:, 20:40] @ w5  =  sum(h * [w5 ; -w5], lanes)
    y = jnp.sum(h * w5d_ref[...], axis=-1, keepdims=True)    # (TB, 1)
    o_ref[...] = y.astype(o_ref.dtype)


def _pack_weights(params):
    """Fold CP path + block-diagonalize + dtype-prepare the weights once."""
    w1, b1, w2, b2, w3, b3, w4, b4, w5, b5 = params
    del b5  # cancels exactly in mlp(x) - mlp(cpx)

    perm = jnp.array(PERM, dtype=jnp.int32)
    w1_cp = -w1[perm, :]                                     # CP folded into L1

    w1_both = jnp.concatenate([w1, w1_cp], axis=1)           # (12, 160) f32
    b1_both = jnp.concatenate([b1, b1], axis=1)              # (1, 160)  f32

    w2_bd = _block_diag2(w2).astype(jnp.bfloat16)            # (160, 160)
    b2_both = jnp.concatenate([b2, b2], axis=1)              # (1, 160)  f32
    w3_bd = _block_diag2(w3).astype(jnp.bfloat16)            # (160, 80)
    b3_both = jnp.concatenate([b3, b3], axis=1)              # (1, 80)   f32
    w4_bd = _block_diag2(w4).astype(jnp.bfloat16)            # (80, 40)
    b4_both = jnp.concatenate([b4, b4], axis=1)              # (1, 40)   f32

    w5_flat = jnp.reshape(w5, (-1,))
    w5_diff = jnp.concatenate([w5_flat, -w5_flat]).reshape(1, 2 * SIZES[4])  # (1,40) f32

    return (w1_both, b1_both, w2_bd, b2_both, w3_bd, b3_both,
            w4_bd, b4_both, w5_diff)


def network_forward(x, params, *, tile_b=1024):
    """x: (B, 12) float32.  params: flat tuple (w1, b1, ..., w5, b5)."""
    weights = _pack_weights(params)

    B = x.shape[0]
    # Tile rows: multiple of 8, capped at tile_b, sized so the grid has >=2
    # steps when B allows (helps megacore sharding on v7x).
    tb = min(tile_b, _round_up(max(pl.cdiv(B, 2), 1), 8))
    b_pad = _round_up(B, tb)
    if b_pad != B:
        x = jnp.pad(x, ((0, b_pad - B), (0, 0)))

    def resident(arr):
        zeros = (0,) * arr.ndim
        return pl.BlockSpec(arr.shape, lambda i, _z=zeros: _z)

    in_specs = [pl.BlockSpec((tb, SIZES[0]), lambda i: (i, 0))]
    in_specs += [resident(w) for w in weights]

    out = pl.pallas_call(
        _kernel,
        grid=(b_pad // tb,),
        in_specs=in_specs,
        out_specs=pl.BlockSpec((tb, 1), lambda i: (i, 0)),
        out_shape=jax.ShapeDtypeStruct((b_pad, 1), jnp.float32),
        compiler_params=pltpu.CompilerParams(
            dimension_semantics=("parallel",),
        ),
    )(x, *weights)
    return out[:B]


# ----------------------------------------------------------------------------
# References: exact f32 mirror of the PyTorch module, plus a mixed-precision
# mirror matching the kernel's bf16 layer-2..4 dtype path.
# ----------------------------------------------------------------------------
def _mlp_ref(h, w1, b1, w2, b2, w3, b3, w4, b4, w5, b5):
    h = _leaky_relu(h @ w1 + b1)
    h = _leaky_relu(h @ w2 + b2)
    h = _leaky_relu(h @ w3 + b3)
    h = _leaky_relu(h @ w4 + b4)
    return h @ w5 + b5


def reference_forward(x, params):
    perm = jnp.array(PERM, dtype=jnp.int32)
    cpx = -x[:, perm]
    return _mlp_ref(x, *params) - _mlp_ref(cpx, *params)


def reference_forward_mixed(x, params):
    """Plain-JAX mirror of the kernel's packed/bf16 compute path."""
    (w1_both, b1_both, w2_bd, b2_both, w3_bd, b3_both,
     w4_bd, b4_both, w5_diff) = _pack_weights(params)
    h = _leaky_relu(jnp.dot(x, w1_both,
                            preferred_element_type=jnp.float32) + b1_both)
    h = _leaky_relu(jnp.dot(h.astype(jnp.bfloat16), w2_bd,
                            preferred_element_type=jnp.float32) + b2_both)
    h = _leaky_relu(jnp.dot(h.astype(jnp.bfloat16), w3_bd,
                            preferred_element_type=jnp.float32) + b3_both)
    h = _leaky_relu(jnp.dot(h.astype(jnp.bfloat16), w4_bd,
                            preferred_element_type=jnp.float32) + b4_both)
    return jnp.sum(h * w5_diff, axis=-1, keepdims=True)


def init_params(key):
    """Mimics torch.nn.Linear init: U[-1/sqrt(fan_in), +1/sqrt(fan_in)]."""
    params = []
    for i in range(len(SIZES) - 1):
        fan_in, fan_out = SIZES[i], SIZES[i + 1]
        key, kw, kb = jax.random.split(key, 3)
        bound = 1.0 / jnp.sqrt(fan_in)
        w = jax.random.uniform(kw, (fan_in, fan_out), jnp.float32, -bound, bound)
        b = jax.random.uniform(kb, (1, fan_out), jnp.float32, -bound, bound)
        params += [w, b]
    return tuple(params)


if __name__ == "__main__":
    key = jax.random.PRNGKey(0)
    key, kx1, kx2 = jax.random.split(key, 3)
    params = init_params(key)

    # Small, tile-aligned batch.
    x8 = jax.random.normal(kx1, (8, 12), dtype=jnp.float32)
    out8 = jax.block_until_ready(network_forward(x8, params))
    assert out8.shape == (8, 1)
    # Strict check against the mixed-precision mirror of the kernel path.
    mix8 = reference_forward_mixed(x8, params)
    assert jnp.allclose(out8, mix8, atol=1e-3, rtol=1e-3), "mismatch vs mixed ref (B=8)"
    # Loose sanity check against the exact f32 PyTorch-equivalent reference
    # (layers 2-4 run in bf16 on the MXU, so tolerance is relaxed).
    ref8 = reference_forward(x8, params)
    assert jnp.allclose(out8, ref8, atol=5e-2, rtol=5e-2), "mismatch vs f32 ref (B=8)"

    # Batch that exercises the padding / multi-tile path.
    x13 = jax.random.normal(kx2, (13, 12), dtype=jnp.float32)
    out13 = jax.block_until_ready(network_forward(x13, params))
    assert out13.shape == (13, 1)
    mix13 = reference_forward_mixed(x13, params)
    assert jnp.allclose(out13, mix13, atol=1e-3, rtol=1e-3), "mismatch vs mixed ref (B=13)"
    ref13 = reference_forward(x13, params)
    assert jnp.allclose(out13, ref13, atol=5e-2, rtol=5e-2), "mismatch vs f32 ref (B=13)"

    print("KERNEL_OK")
</pallas_src>

<mosaic_0001>
module attributes {stable_mosaic.version = 11 : i64} {
  func.func @_kernel(%arg0: i32, %arg1: memref<8x12xf32, #tpu.memory_space<vmem>>, %arg2: memref<12x160xf32, #tpu.memory_space<vmem>>, %arg3: memref<1x160xf32, #tpu.memory_space<vmem>>, %arg4: memref<160x160xbf16, #tpu.memory_space<vmem>>, %arg5: memref<1x160xf32, #tpu.memory_space<vmem>>, %arg6: memref<160x80xbf16, #tpu.memory_space<vmem>>, %arg7: memref<1x80xf32, #tpu.memory_space<vmem>>, %arg8: memref<80x40xbf16, #tpu.memory_space<vmem>>, %arg9: memref<1x40xf32, #tpu.memory_space<vmem>>, %arg10: memref<1x40xf32, #tpu.memory_space<vmem>>, %arg11: memref<8x1xf32, #tpu.memory_space<vmem>>) attributes {dimension_semantics = [#tpu.dimension_semantics<parallel>], iteration_bounds = array<i64: 1>, scalar_prefetch = 0 : i64, scratch_operands = 0 : i64, tpu.core_type = #tpu.core_type<tc>, window_params = [{transform_indices = @transform_0, window_bounds = array<i64: 8, 12>}, {pipeline_mode = #tpu.pipeline_mode<synchronous>, transform_indices = @transform_1, window_bounds = array<i64: 12, 160>}, {pipeline_mode = #tpu.pipeline_mode<synchronous>, transform_indices = @transform_2, window_bounds = array<i64: 1, 160>}, {pipeline_mode = #tpu.pipeline_mode<synchronous>, transform_indices = @transform_3, window_bounds = array<i64: 160, 160>}, {pipeline_mode = #tpu.pipeline_mode<synchronous>, transform_indices = @transform_4, window_bounds = array<i64: 1, 160>}, {pipeline_mode = #tpu.pipeline_mode<synchronous>, transform_indices = @transform_5, window_bounds = array<i64: 160, 80>}, {pipeline_mode = #tpu.pipeline_mode<synchronous>, transform_indices = @transform_6, window_bounds = array<i64: 1, 80>}, {pipeline_mode = #tpu.pipeline_mode<synchronous>, transform_indices = @transform_7, window_bounds = array<i64: 80, 40>}, {pipeline_mode = #tpu.pipeline_mode<synchronous>, transform_indices = @transform_8, window_bounds = array<i64: 1, 40>}, {pipeline_mode = #tpu.pipeline_mode<synchronous>, transform_indices = @transform_9, window_bounds = array<i64: 1, 40>}, {transform_indices = @transform_10, window_bounds = array<i64: 8, 1>}]} {
    %c0 = arith.constant 0 : index
    %c0_0 = arith.constant 0 : index
    %0 = vector.load %arg1[%c0, %c0_0] : memref<8x12xf32, #tpu.memory_space<vmem>>, vector<8x12xf32>
    %c0_1 = arith.constant 0 : index
    %c0_2 = arith.constant 0 : index
    %1 = vector.load %arg2[%c0_1, %c0_2] : memref<12x160xf32, #tpu.memory_space<vmem>>, vector<12x160xf32>
    %cst = arith.constant dense<0.000000e+00> : vector<8x160xf32>
    %2 = tpu.matmul %0, %1, %cst {dimension_numbers = #tpu.dot_dimension_numbers<[1], [0], [0], [1], [0, 0, 1, 1], [], []>} : vector<8x12xf32>, vector<12x160xf32>, vector<8x160xf32> -> vector<8x160xf32>
    %c0_3 = arith.constant 0 : index
    %c0_4 = arith.constant 0 : index
    %3 = vector.load %arg3[%c0_3, %c0_4] : memref<1x160xf32, #tpu.memory_space<vmem>>, vector<1x160xf32>
    %4 = vector.broadcast %3 : vector<1x160xf32> to vector<8x160xf32>
    %5 = arith.addf %2, %4 : vector<8x160xf32>
    %cst_5 = arith.constant 0.000000e+00 : f32
    %6 = vector.broadcast %cst_5 : f32 to vector<8x160xf32>
    %7 = arith.cmpf ogt, %5, %6 : vector<8x160xf32>
    %cst_6 = arith.constant 0.00999999977 : f32
    %8 = vector.broadcast %cst_6 : f32 to vector<8x160xf32>
    %9 = arith.mulf %8, %5 : vector<8x160xf32>
    %10 = arith.select %7, %5, %9 : vector<8x160xi1>, vector<8x160xf32>
    %11 = arith.truncf %10 : vector<8x160xf32> to vector<8x160xbf16>
    %c0_7 = arith.constant 0 : index
    %c0_8 = arith.constant 0 : index
    %12 = vector.load %arg4[%c0_7, %c0_8] : memref<160x160xbf16, #tpu.memory_space<vmem>>, vector<160x160xbf16>
    %cst_9 = arith.constant dense<0.000000e+00> : vector<8x160xf32>
    %13 = tpu.matmul %11, %12, %cst_9 {dimension_numbers = #tpu.dot_dimension_numbers<[1], [0], [0], [1], [0, 0, 1, 1], [], []>} : vector<8x160xbf16>, vector<160x160xbf16>, vector<8x160xf32> -> vector<8x160xf32>
    %c0_10 = arith.constant 0 : index
    %c0_11 = arith.constant 0 : index
    %14 = vector.load %arg5[%c0_10, %c0_11] : memref<1x160xf32, #tpu.memory_space<vmem>>, vector<1x160xf32>
    %15 = vector.broadcast %14 : vector<1x160xf32> to vector<8x160xf32>
    %16 = arith.addf %13, %15 : vector<8x160xf32>
    %cst_12 = arith.constant 0.000000e+00 : f32
    %17 = vector.broadcast %cst_12 : f32 to vector<8x160xf32>
    %18 = arith.cmpf ogt, %16, %17 : vector<8x160xf32>
    %cst_13 = arith.constant 0.00999999977 : f32
    %19 = vector.broadcast %cst_13 : f32 to vector<8x160xf32>
    %20 = arith.mulf %19, %16 : vector<8x160xf32>
    %21 = arith.select %18, %16, %20 : vector<8x160xi1>, vector<8x160xf32>
    %22 = arith.truncf %21 : vector<8x160xf32> to vector<8x160xbf16>
    %c0_14 = arith.constant 0 : index
    %c0_15 = arith.constant 0 : index
    %23 = vector.load %arg6[%c0_14, %c0_15] : memref<160x80xbf16, #tpu.memory_space<vmem>>, vector<160x80xbf16>
    %cst_16 = arith.constant dense<0.000000e+00> : vector<8x80xf32>
    %24 = tpu.matmul %22, %23, %cst_16 {dimension_numbers = #tpu.dot_dimension_numbers<[1], [0], [0], [1], [0, 0, 1, 1], [], []>} : vector<8x160xbf16>, vector<160x80xbf16>, vector<8x80xf32> -> vector<8x80xf32>
    %c0_17 = arith.constant 0 : index
    %c0_18 = arith.constant 0 : index
    %25 = vector.load %arg7[%c0_17, %c0_18] : memref<1x80xf32, #tpu.memory_space<vmem>>, vector<1x80xf32>
    %26 = vector.broadcast %25 : vector<1x80xf32> to vector<8x80xf32>
    %27 = arith.addf %24, %26 : vector<8x80xf32>
    %cst_19 = arith.constant 0.000000e+00 : f32
    %28 = vector.broadcast %cst_19 : f32 to vector<8x80xf32>
    %29 = arith.cmpf ogt, %27, %28 : vector<8x80xf32>
    %cst_20 = arith.constant 0.00999999977 : f32
    %30 = vector.broadcast %cst_20 : f32 to vector<8x80xf32>
    %31 = arith.mulf %30, %27 : vector<8x80xf32>
    %32 = arith.select %29, %27, %31 : vector<8x80xi1>, vector<8x80xf32>
    %33 = arith.truncf %32 : vector<8x80xf32> to vector<8x80xbf16>
    %c0_21 = arith.constant 0 : index
    %c0_22 = arith.constant 0 : index
    %34 = vector.load %arg8[%c0_21, %c0_22] : memref<80x40xbf16, #tpu.memory_space<vmem>>, vector<80x40xbf16>
    %cst_23 = arith.constant dense<0.000000e+00> : vector<8x40xf32>
    %35 = tpu.matmul %33, %34, %cst_23 {dimension_numbers = #tpu.dot_dimension_numbers<[1], [0], [0], [1], [0, 0, 1, 1], [], []>} : vector<8x80xbf16>, vector<80x40xbf16>, vector<8x40xf32> -> vector<8x40xf32>
    %c0_24 = arith.constant 0 : index
    %c0_25 = arith.constant 0 : index
    %36 = vector.load %arg9[%c0_24, %c0_25] : memref<1x40xf32, #tpu.memory_space<vmem>>, vector<1x40xf32>
    %37 = vector.broadcast %36 : vector<1x40xf32> to vector<8x40xf32>
    %38 = arith.addf %35, %37 : vector<8x40xf32>
    %cst_26 = arith.constant 0.000000e+00 : f32
    %39 = vector.broadcast %cst_26 : f32 to vector<8x40xf32>
    %40 = arith.cmpf ogt, %38, %39 : vector<8x40xf32>
    %cst_27 = arith.constant 0.00999999977 : f32
    %41 = vector.broadcast %cst_27 : f32 to vector<8x40xf32>
    %42 = arith.mulf %41, %38 : vector<8x40xf32>
    %43 = arith.select %40, %38, %42 : vector<8x40xi1>, vector<8x40xf32>
    %c0_28 = arith.constant 0 : index
    %c0_29 = arith.constant 0 : index
    %44 = vector.load %arg10[%c0_28, %c0_29] : memref<1x40xf32, #tpu.memory_space<vmem>>, vector<1x40xf32>
    %45 = vector.broadcast %44 : vector<1x40xf32> to vector<8x40xf32>
    %46 = arith.mulf %43, %45 : vector<8x40xf32>
    %cst_30 = arith.constant dense<0.000000e+00> : vector<8xf32>
    %47 = vector.multi_reduction <add>, %46, %cst_30 [1] : vector<8x40xf32> to vector<8xf32>
    %48 = vector.shape_cast %47 : vector<8xf32> to vector<8x1xf32>
    %c0_31 = arith.constant 0 : index
    %c0_32 = arith.constant 0 : index
    %49 = vector.load %arg11[%c0_31, %c0_32] : memref<8x1xf32, #tpu.memory_space<vmem>>, vector<8x1xf32>
    tpu.vector_store %arg11[%c0_31, %c0_32], %48 {strides = array<i32>} : memref<8x1xf32, #tpu.memory_space<vmem>>, vector<8x1xf32>,
    return
  }
  func.func @transform_0(%arg0: i32) -> (i32, i32) {
    %c0_i32 = arith.constant 0 : i32
    %c0_i32_0 = arith.constant 0 : i32
    return %arg0, %c0_i32 : i32, i32
  }
  func.func @transform_1(%arg0: i32) -> (i32, i32) {
    %c0_i32 = arith.constant 0 : i32
    %c0_i32_0 = arith.constant 0 : i32
    %c0_i32_1 = arith.constant 0 : i32
    return %c0_i32, %c0_i32_0 : i32, i32
  }
  func.func @transform_2(%arg0: i32) -> (i32, i32) {
    %c0_i32 = arith.constant 0 : i32
    %c0_i32_0 = arith.constant 0 : i32
    %c0_i32_1 = arith.constant 0 : i32
    return %c0_i32, %c0_i32_0 : i32, i32
  }
  func.func @transform_3(%arg0: i32) -> (i32, i32) {
    %c0_i32 = arith.constant 0 : i32
    %c0_i32_0 = arith.constant 0 : i32
    %c0_i32_1 = arith.constant 0 : i32
    return %c0_i32, %c0_i32_0 : i32, i32
  }
  func.func @transform_4(%arg0: i32) -> (i32, i32) {
    %c0_i32 = arith.constant 0 : i32
    %c0_i32_0 = arith.constant 0 : i32
    %c0_i32_1 = arith.constant 0 : i32
    return %c0_i32, %c0_i32_0 : i32, i32
  }
  func.func @transform_5(%arg0: i32) -> (i32, i32) {
    %c0_i32 = arith.constant 0 : i32
    %c0_i32_0 = arith.constant 0 : i32
    %c0_i32_1 = arith.constant 0 : i32
    return %c0_i32, %c0_i32_0 : i32, i32
  }
  func.func @transform_6(%arg0: i32) -> (i32, i32) {
    %c0_i32 = arith.constant 0 : i32
    %c0_i32_0 = arith.constant 0 : i32
    %c0_i32_1 = arith.constant 0 : i32
    return %c0_i32, %c0_i32_0 : i32, i32
  }
  func.func @transform_7(%arg0: i32) -> (i32, i32) {
    %c0_i32 = arith.constant 0 : i32
    %c0_i32_0 = arith.constant 0 : i32
    %c0_i32_1 = arith.constant 0 : i32
    return %c0_i32, %c0_i32_0 : i32, i32
  }
  func.func @transform_8(%arg0: i32) -> (i32, i32) {
    %c0_i32 = arith.constant 0 : i32
    %c0_i32_0 = arith.constant 0 : i32
    %c0_i32_1 = arith.constant 0 : i32
    return %c0_i32, %c0_i32_0 : i32, i32
  }
  func.func @transform_9(%arg0: i32) -> (i32, i32) {
    %c0_i32 = arith.constant 0 : i32
    %c0_i32_0 = arith.constant 0 : i32
    %c0_i32_1 = arith.constant 0 : i32
    return %c0_i32, %c0_i32_0 : i32, i32
  }
  func.func @transform_10(%arg0: i32) -> (i32, i32) {
    %c0_i32 = arith.constant 0 : i32
    %c0_i32_0 = arith.constant 0 : i32
    return %arg0, %c0_i32 : i32, i32
  }
}

</mosaic_0001>

<bundles_post_ra>
// kernel: tpu_custom_call.1
= control target key start
LH: loop header
LB: loop body
LE: loop exit
PB: predicated region body
PF: predicated region fallthrough
CT: control target
= control target key end

     0   :  { %15 = vsyncpa [#allocation3], 0  ;;  %s893_s0 = inlined_call_operand.vmem [shape: f32[8,12], index: 0, kind: input, shape index: {}]   ;;  %s894_s1 = inlined_call_operand.vmem [shape: f32[12,160], index: 1, kind: input, shape index: {}]   ;;  %s895_s2 = inlined_call_operand.vmem [shape: f32[1,160], index: 2, kind: input, shape index: {}]   ;;  %s896_s3 = inlined_call_operand.hbm [shape: bf16[160,160], index: 3, kind: input, shape index: {}]   ;;  %s897_s4 = inlined_call_operand.vmem [shape: f32[1,160], index: 4, kind: input, shape index: {}]   ;;  %s898_s5 = inlined_call_operand.hbm [shape: bf16[160,80], index: 5, kind: input, shape index: {}]   ;;  %s899_s6 = inlined_call_operand.vmem [shape: f32[1,80], index: 6, kind: input, shape index: {}]   ;;  %s900_s7 = inlined_call_operand.vmem [shape: bf16[80,40], index: 7, kind: input, shape index: {}]   ;;  %s901_s8 = inlined_call_operand.vmem [shape: f32[1,40], index: 8, kind: input, shape index: {}]   ;;  %s902_s9 = inlined_call_operand.vmem [shape: f32[1,40], index: 9, kind: input, shape index: {}]   ;;  %s903_s10 = inlined_call_operand.vmem [shape: f32[8,1], index: 10, kind: output, shape index: {}]  }
   0x1   :  { %16 = vsyncpa [#allocation5], 0  ;;  %s766_s13 = smov [#allocation2]  }
   0x2   :  { %s28_s14 = sshll.u32 %s766_s13, 4  ;;  %s29_s14 = int_to_ptr.vmem [resolvable:$true] %s28_s14 }
   0x3   :  { %s730_s15 = scalar_lea.vmem %s29_s14, 2560  ;;  %p735_p1 = scmp.lt.s32.totalorder %s29_s14, %s29_s14 }
   0x4   :  { %p731_p0 = scmp.ne.s32.totalorder %s29_s14, %s730_s15  ;;  %p736_p2 = scmp.lt.s32.totalorder %s730_s15, %s730_s15 }
   0x6   :  { %p737_p3 = por %p736_p2, %p735_p1 }
   0x8   :  { %p738_p4 = pnand %p737_p3, %p731_p0 }
   0xa   :  { %741 = shalt.err (!%p738_p4)
}
   0xb   :  { %s767_s16 = smov 128   ;;  %s768_s17 = smov 8  }
   0xc   :  { %34 = dma.hbm_to_vmem [thread:$0]  %s896_s3, 2560, %s29_s14, [#allocation3], %s767_s16, %s767_s16, %s768_s17  }
   0xd   :  { %s769_s20 = smov [#allocation4]  }
   0xe   :  { %s42_s21 = sshll.u32 %s769_s20, 4  ;;  %s43_s21 = int_to_ptr.vmem [resolvable:$true] %s42_s21 }
   0xf   :  { %s750_s22 = scalar_lea.vmem %s43_s21, 1280  ;;  %p755_p6 = scmp.lt.s32.totalorder %s43_s21, %s43_s21 }
  0x10   :  { %p751_p5 = scmp.ne.s32.totalorder %s43_s21, %s750_s22  ;;  %p756_p7 = scmp.lt.s32.totalorder %s750_s22, %s750_s22 }
  0x12   :  { %p757_p8 = por %p756_p7, %p755_p6 }
  0x14   :  { %p758_p9 = pnand %p757_p8, %p751_p5 }
  0x16   :  { %761 = shalt.err (!%p758_p9)
}
  0x17   :  { %s770_s23 = smov 64   ;;  %s771_s24 = smov 4  }
  0x18   :  { %48 = dma.hbm_to_vmem [thread:$0]  %s898_s5, 1280, %s43_s21, [#allocation5], %s770_s23, %s770_s23, %s771_s24  }
  0x19   :  { %762 = dma.done.wait [#allocation3], 2560  }
  0x1a   :  { %763 = vsyncadd [#allocation3], 4294964736 }
  0x1b   :  { %764 = dma.done.wait [#allocation5], 1280  }
  0x1c   :  { %765 = vsyncadd [#allocation5], 4294966016  ;;  %v772_v0 = vmov 0.0   ;;  %vm85_vm0 = vcmask 1043456   ;;  %v68_v1 = vld [vmem:[%s894_s1 + $0x18] sm:$0xf]  ;;  %v71_v34 = vlaneseq }
  0x1d   :  { %156 = vmatprep.mubr.f32.mxu0 %v772_v0  ;;  %v67_v2 = vld [vmem:[%s894_s1 + $0x10] sm:$0xf]  ;;  %v66_v3 = vld [vmem:[%s894_s1 + $0x8] sm:$0xff]  ;;  %604 = vmatprep.subr.msk.mxu0 %vm85_vm0, %v68_v1  ;;  %v65_v4 = vld [vmem:[%s894_s1] sm:$0xff]  ;;  %vm81_vm1 = vcmask 97280   ;;  %v773_v27 = vmov 0  }
  0x1e   :  { %v64_v5 = vld [vmem:[%s893_s0] sm:$0xff]  ;;  %605 = vmatpush1.msk.msra.mxu0 %vm85_vm0, %v67_v2  ;;  %v677_v6 = vld [vmem:[#allocation2 + $0x74] ss:$8 sps:$4 sm:$0xff]   ;;  %v679_v7 = vld [vmem:[#allocation2 + $0x70] ss:$8 sps:$4 sm:$0xff]   ;;  %v72_v35 = vshrl.u32 %v71_v34, 7 }
  0x1f   :  { %122 = vmatprep.subr.mxu0 %v66_v3  ;;  %v680_v8 = vld [vmem:[#allocation2 + $0x64] ss:$8 sps:$4 sm:$0xff]   ;;  %307 = vmatprep.subr.bf16.mxu1 %v677_v6  ;;  %v682_v9 = vld [vmem:[#allocation2 + $0x60] ss:$8 sps:$4 sm:$0xff]   ;;  %v683_v10 = vld [vmem:[#allocation2 + $0x54] ss:$8 sps:$4 sm:$0xff]  }
  0x20   :  { %123 = vmatpush1.msra.mxu0 %v65_v4  ;;  %308 = vmatpush1.bf16.msra.mxu1 %v679_v7  ;;  %v685_v11 = vld [vmem:[#allocation2 + $0x50] ss:$8 sps:$4 sm:$0xff]   ;;  %v686_v12 = vld [vmem:[#allocation2 + $0x44] ss:$8 sps:$4 sm:$0xff]   ;;  %v688_v13 = vld [vmem:[#allocation2 + $0x40] ss:$8 sps:$4 sm:$0xff]  }
  0x21   :  { %606 = vmatmul.mubr.msk.f32.vlgmr.msra.gmra.mxu0 %vm81_vm1, %v64_v5  ;;  %309 = vmatprep.subr.bf16.mxu1 %v680_v8  ;;  %v689_v14 = vld [vmem:[#allocation2 + $0x34] ss:$8 sps:$4 sm:$0xff]   ;;  %v691_v15 = vld [vmem:[#allocation2 + $0x30] ss:$8 sps:$4 sm:$0xff]   ;;  %v692_v16 = vld [vmem:[#allocation2 + $0x24] ss:$8 sps:$4 sm:$0xff]  }
  0x22   :  { %v694_v17 = vld [vmem:[#allocation2 + $0x20] ss:$8 sps:$4 sm:$0xff]   ;;  %v695_v18 = vld [vmem:[#allocation2 + $0x14] ss:$8 sps:$4 sm:$0xff]   ;;  %v697_v19 = vld [vmem:[#allocation2 + $0x10] ss:$8 sps:$4 sm:$0xff]   ;;  %446 = vmatprep.subr.bf16.mxu0 %v773_v27 }
  0x23   :  { %v698_v20 = vld [vmem:[#allocation2 + $0x4] ss:$8 sps:$4 sm:$0xff]   ;;  %v700_v21 = vld [vmem:[#allocation2] ss:$8 sps:$4 sm:$0xff]   ;;  %v701_v22 = vld [vmem:[#allocation2 + $0x94] ss:$8 sps:$4 sm:$0xff]  }
  0x24   :  { %310 = vmatpush1.bf16.msra.mxu1 %v682_v9  ;;  %v703_v23 = vld [vmem:[#allocation2 + $0x90] ss:$8 sps:$4 sm:$0xff]   ;;  %v704_v24 = vld [vmem:[#allocation2 + $0x84] ss:$8 sps:$4 sm:$0xff]   ;;  %v706_v25 = vld [vmem:[#allocation2 + $0x80] ss:$8 sps:$4 sm:$0xff]  }
  0x25   :  { %311 = vmatprep.subr.bf16.mxu1 %v683_v10  ;;  %v707_v26 = vld [vmem:[#allocation4 + $0x38] sm:$0xff]   ;;  %v708_v28 = vld [vmem:[#allocation4 + $0x30] sm:$0xff]   ;;  %v709_v29 = vld [vmem:[#allocation4 + $0x28] sm:$0xff]   ;;  %v73_v36 = vsub.s32 0, %v72_v35  ;;  %v77_v38 = vsub.s32 1, %v72_v35  ;;  %vm303_vm4 = vcmask 261120  }
  0x26   :  { %447 = vmatpush1.bf16.msra.mxu0 %v707_v26  ;;  %v710_v30 = vld [vmem:[#allocation4 + $0x20] sm:$0xff]   ;;  %v711_v31 = vld [vmem:[#allocation4 + $0x18] sm:$0xff]   ;;  %v712_v32 = vld [vmem:[#allocation4 + $0x10] sm:$0xff]   ;;  %vm774_vm7 = vmmov 0   ;;  %vm537_vm9 = vcmask 654336   ;;  %vm592_vm11 = vcmask 326656  }
  0x27   :  { %448 = vmatprep.subr.bf16.mxu0 %v773_v27  ;;  %v713_v33 = vld [vmem:[#allocation4 + $0x8] sm:$0xff]   ;;  %v69_v37 = vld [vmem:[%s895_s2] sm:$0x3]  ;;  %v718_v55 = vld [vmem:[%s900_s7 + $0x18] sm:$0xff]   ;;  %vm596_vm12 = vcmask 7168  }
  0x28   :  { %312 = vmatpush1.bf16.msra.mxu1 %v685_v11  ;;  %v74_v39 = vrot.slane %v69_v37, %v73_v36  ;;  %v78_v40 = vrot.slane %v69_v37, %v77_v38  ;;  %v714_v51 = vld [vmem:[#allocation4] sm:$0xff]   ;;  %v715_v52 = vld [vmem:[#allocation4 + $0x48] sm:$0xff]   ;;  %v719_v56 = vld [vmem:[%s900_s7 + $0x10] sm:$0xff]  }
  0x29   :  { %313 = vmatprep.subr.bf16.mxu1 %v686_v12  ;;  %v716_v53 = vld [vmem:[#allocation4 + $0x40] sm:$0xff]   ;;  %v720_v9 = vld [vmem:[%s900_s7 + $0x8] sm:$0xff]  }
  0x2a   :  { %449 = vmatpush1.bf16.msra.mxu0 %v708_v28  ;;  %v717_v54 = vld [vmem:[%s900_s7 + $0x20] sm:$0xff]  }
  0x2b   :  { %450 = vmatprep.subr.bf16.mxu0 %v773_v27  ;;  %v191_v57 = vld [vmem:[%s897_s4] sm:$0x3] }
  0x2c   :  { %314 = vmatpush1.bf16.msra.mxu1 %v688_v13  ;;  %v196_v58 = vrot.slane %v191_v57, %v73_v36  ;;  %v200_v59 = vrot.slane %v191_v57, %v77_v38  ;;  %v721_v10 = vld [vmem:[%s900_s7] sm:$0xff]  }
  0x2d   :  { %315 = vmatprep.subr.bf16.mxu1 %v689_v14  ;;  %v628_v11 = vld [vmem:[%s899_s6] ss:$0 sm:$0xff] }
  0x2e   :  { %451 = vmatpush1.bf16.msra.mxu0 %v709_v29 }
  0x2f   :  { %452 = vmatprep.subr.bf16.mxu0 %v773_v27 }
  0x30   :  { %316 = vmatpush1.bf16.msra.mxu1 %v691_v15 }
  0x31   :  { %317 = vmatprep.subr.bf16.mxu1 %v692_v16 }
  0x32   :  { %453 = vmatpush1.bf16.msra.mxu0 %v710_v30 }
  0x33   :  { %454 = vmatprep.subr.bf16.mxu0 %v773_v27 }
  0x34   :  { %318 = vmatpush1.bf16.msra.mxu1 %v694_v17 }
  0x35   :  { %319 = vmatprep.subr.bf16.mxu1 %v695_v18 }
  0x36   :  { %455 = vmatpush1.bf16.msra.mxu0 %v711_v31 }
  0x37   :  { %456 = vmatprep.subr.bf16.mxu0 %v773_v27 }
  0x38   :  { %320 = vmatpush1.bf16.msra.mxu1 %v697_v19 }
  0x39   :  { %321 = vmatprep.subr.bf16.mxu1 %v698_v20  ;;  %v640_v20 = vld [vmem:[%s901_s8] ss:$0 sm:$0xff] }
  0x3a   :  { %457 = vmatpush1.bf16.msra.mxu0 %v712_v32 }
  0x3b   :  { %458 = vmatprep.subr.bf16.mxu0 %v773_v27 }
  0x3c   :  { %322 = vmatpush1.bf16.msra.mxu1 %v700_v21 }
  0x3d   :  { %335 = vmatprep.subr.bf16.mxu1 %v701_v22 }
  0x3e   :  { %459 = vmatpush1.bf16.msra.mxu0 %v713_v33 }
  0x3f   :  { %460 = vmatprep.subr.bf16.mxu0 %v773_v27 }
  0x40   :  { %336 = vmatpush2.bf16.msra.mxu1 %v703_v23 }
  0x41   :  { %337 = vmatprep.subr.bf16.mxu1 %v704_v24  ;;  %v647_v24 = vld [vmem:[%s902_s9] ss:$0 sm:$0xff] }
  0x42   :  { %461 = vmatpush1.bf16.msra.mxu0 %v714_v51 }
  0x43   :  { %474 = vmatprep.subr.bf16.mxu0 %v773_v27 }
  0x44   :  { %338 = vmatpush2.bf16.msra.mxu1 %v706_v25 }
  0x45   :  { %654 = vmatprep.subr.bf16.mxu1 %v772_v0 }
  0x46   :  { %475 = vmatpush2.bf16.msra.mxu0 %v715_v52 }
  0x47   :  { %476 = vmatprep.subr.bf16.mxu0 %v773_v27 }
  0x4a   :  { %477 = vmatpush2.bf16.msra.mxu0 %v716_v53 }
  0xe1   :  { %v158_v41 = vpop.f32.mrf.mxu0 }
  0xe2   :  { %v159_v42 = vadd.f32 %v158_v41, %v74_v39 }
  0xe3   :  { %v160_v43 = vpop.f32.mrf.mxu0 }
  0xe4   :  { %vm163_vm2 = vcmp.gt.f32.partialorder %v159_v42, 0.0  ;;  %v165_v44 = vmul.f32 0.01, %v159_v42  ;;  %v161_v45 = vadd.f32 %v160_v43, %v78_v40 }
  0xe6   :  { %v166_v46 = vmul.f32 0.01, %v161_v45  ;;  %vm164_vm3 = vcmp.gt.f32.partialorder %v161_v45, 0.0  ;;  %v167_v47 = vsel %vm163_vm2, %v159_v42, %v165_v44 }
  0xe7   :  { %v169_v50 = vpack.c.bf16 %v167_v47, %v167_v47 }
  0xe8   :  { %v168_v48 = vsel %vm164_vm3, %v161_v45, %v166_v46 }
  0xe9   :  { %v170_v49 = vpack.c.bf16 %v168_v48, %v168_v48 }
  0xeb   :  { %627 = vmatprep.mubr.msk.bf16.mxu1 %vm303_vm4, %v170_v49 }
  0xec   :  { %340 = vmatmul.mubr.bf16.vlgmr.msra.gmra.mxu1 %v169_v50 }
  0xed   :  { %655 = vmatpush3.bf16.msra.mxu1 %v717_v54  ;;  %664 = vmatprep.mubr.msk.bf16.mxu1 %vm774_vm7, %v772_v0 }
  0xee   :  { %656 = vmatprep.subr.bf16.mxu1 %v772_v0 }
  0xf1   :  { %657 = vmatpush3.bf16.msra.mxu1 %v718_v55 }
  0xf2   :  { %658 = vmatprep.subr.bf16.mxu1 %v772_v0 }
  0xf5   :  { %659 = vmatpush3.bf16.msra.mxu1 %v719_v56 }
  0xf6   :  { %660 = vmatprep.subr.bf16.mxu1 %v772_v0 }
  0xf9   :  { %661 = vmatpush3.bf16.msra.mxu1 %v720_v9 }
  0xfa   :  { %662 = vmatprep.subr.bf16.mxu1 %v772_v0 }
  0xfd   :  { %663 = vmatpush3.bf16.msra.mxu1 %v721_v10 }
 0x1ac   :  { %v341_v60 = vpop.f32.mrf.mxu1 }
 0x1ad   :  { %v342_v61 = vadd.f32 %v341_v60, %v196_v58 }
 0x1ae   :  { %v343_v62 = vpop.f32.mrf.mxu1 }
 0x1af   :  { %vm348_vm5 = vcmp.gt.f32.partialorder %v342_v61, 0.0  ;;  %v350_v63 = vmul.f32 0.01, %v342_v61  ;;  %v344_v1 = vadd.f32 %v343_v62, %v200_v59 }
 0x1b0   :  { %v345_v2 = vpop.f32.mrf.mxu1 }
 0x1b1   :  { %vm349_vm6 = vcmp.gt.f32.partialorder %v344_v1, 0.0  ;;  %v351_v3 = vmul.f32 0.01, %v344_v1  ;;  %v352_v4 = vsel %vm348_vm5, %v342_v61, %v350_v63 }
 0x1b2   :  { %v346_v5 = vpop.f32.mrf.mxu1  ;;  %v354_v8 = vpack.c.bf16 %v352_v4, %v352_v4 }
 0x1b3   :  { %v353_v6 = vsel %vm349_vm6, %v344_v1, %v351_v3 }
 0x1b4   :  { %v355_v7 = vpack.c.bf16 %v353_v6, %v353_v6 }
 0x1b6   :  { %639 = vmatprep.mubr.msk.bf16.mxu0 %vm303_vm4, %v355_v7 }
 0x1b7   :  { %479 = vmatmul.mubr.bf16.vlgmr.msra.gmra.mxu0 %v354_v8 }
 0x277   :  { %v480_v12 = vpop.f32.mrf.mxu0 }
 0x278   :  { %v481_v13 = vadd.f32 %v628_v11, %v480_v12 }
 0x279   :  { %v482_v14 = vpop.f32.mrf.mxu0 }
 0x27a   :  { %vm486_vm8 = vcmp.gt.f32.partialorder %v481_v13, 0.0  ;;  %v487_v15 = vmul.f32 0.01, %v481_v13 }
 0x27b   :  { %v483_v16 = vpop.f32.mrf.mxu0 }
 0x27c   :  { %v488_v17 = vsel %vm486_vm8, %v481_v13, %v487_v15 }
 0x27d   :  { %v489_v18 = vpack.c.bf16 %v488_v17, %v488_v17  ;;  %v484_v19 = vpop.f32.mrf.mxu0 }
 0x27f   :  { %665 = vmatmul.mubr.msk.bf16.vlgmr.msra.gmra.mxu1 %vm537_vm9, %v489_v18 }
 0x33f   :  { %v575_v0 = vpop.f32.mrf.mxu1 }
 0x340   :  { %v576_v21 = vadd.f32 %v640_v20, %v575_v0 }
 0x341   :  { %v666_v22 = vpop.f32.mrf.mxu1 }
 0x342   :  { %v582_v23 = vmul.f32 0.01, %v576_v21  ;;  %vm581_vm10 = vcmp.gt.f32.partialorder %v576_v21, 0.0 }
 0x343   :  { %v578_v25 = vpop.f32.mrf.mxu1 }
 0x344   :  { %v583_v26 = vsel %vm581_vm10, %v576_v21, %v582_v23 }
 0x345   :  { %v667_v27 = vpop.f32.mrf.mxu1  ;;  %v591_v28 = vmul.f32 %v647_v24, %v583_v26 }
 0x347   :  { %v593_v29 = vsel %vm592_vm11, %v591_v28, 0.0 }
 0x348   :  { %594 = vadd.xlane.f32.xlu0 %v593_v29 }
 0x3d1   :  { %v595_v30 = vpop.xlane.xlu0 %594 }
 0x3d2   :  { %597 = vst.msk [vmem:[%s903_s10] sm:$0xff] %vm596_vm12, %v595_v30 }
 0x3d3   :  { %602 = vsyncpa [#allocation3], 1 }
 0x3d4   :  { %603 = vsyncpa [#allocation5], 1 }

</bundles_post_ra>
